<compile_context>
chip_gen: v5e
topology: v5e:2x2
jax: 0.10.0
libtpu: 0.0.40
codegen_flags: <defaults>
</compile_context>

<pallas_src>
import math
import functools

import jax
import jax.numpy as jnp
from jax import lax
from jax.experimental import pallas as pl
from jax.experimental.pallas import tpu as pltpu


_NEG_INF = -1e30
_MIB = 1024 * 1024


def _round_up(v, m):
    return ((v + m - 1) // m) * m


def _vmem_cap_bytes():
    """Usable VMEM ceiling: ~75% of physical, never above 100 MiB (v7x has 64 MiB total)."""
    try:
        phys = int(pltpu.get_tpu_info().vmem_capacity_bytes)
    except Exception:
        phys = 64 * _MIB          # conservative (v7x-sized) fallback
    return min(int(0.75 * phys), 100 * _MIB)


def _vmem_limit(estimate, cap):
    return int(min(max(int(1.5 * estimate), min(32 * _MIB, cap)), cap))


def _use_bf16_exp():
    """bf16 EUP exists on v6e and newer; keep f32 transcendentals on v5e and older."""
    try:
        kind = jax.devices()[0].device_kind.lower()
    except Exception:
        return False
    return not any(t in kind for t in ("v2", "v3", "v4", "v5"))


def _attn_vmem_estimate(ch, lq, tk, xb):
    blocks = 2 * (ch * lq * xb      # residual x block (double buffered)
                  + ch * lq * 2     # q block
                  + 2 * ch * tk * 2  # k + v tiles
                  + tk * 4          # key bias column
                  + ch * lq * xb)   # output block
    scratch = (2 * lq + ch * lq) * 4
    interm = 3 * tk * lq * 4 + 3 * ch * lq * 4 + ch * tk * 4
    return blocks + scratch + interm


# ---------------------------------------------------------------------------
# Kernel 1: GroupNorm(32, C) + merged 1x1 conv producing the full qkv slab
# ---------------------------------------------------------------------------
def _gn_qkv_kernel(x_ref, gamma_ref, beta_ref, w_ref, bias_ref, gmask_ref,
                   qkv_ref, *, eps, l_true, l_pad):
    x = x_ref[0].astype(jnp.float32)                       # (C, Lp)
    gmask = gmask_ref[...]                                 # (C, C): 1/(gsz*L) within group

    # GroupNorm stats without a full-tensor relayout: lane-axis reduce per channel,
    # then fold the tiny (C,1) sums into group stats via a block-diag averaging matrix.
    ch_sum = jnp.sum(x, axis=1, keepdims=True)             # (C, 1)
    mean_c = jnp.dot(gmask, ch_sum, preferred_element_type=jnp.float32)

    d = x - mean_c                                         # (C, Lp)
    ch_sq = jnp.sum(d * d, axis=1, keepdims=True)          # (C, 1)  two-pass variance
    if l_pad != l_true:
        # zero-padded lanes contributed exactly mean^2 each; remove them exactly
        ch_sq = ch_sq - float(l_pad - l_true) * (mean_c * mean_c)
    var_c = jnp.dot(gmask, ch_sq, preferred_element_type=jnp.float32)

    xn = d * (lax.rsqrt(var_c + eps) * gamma_ref[...]) + beta_ref[...]

    # one merged 1x1 conv: (3C, C) @ (C, Lp), bf16 operands, f32 accumulation on MXU.
    # The softmax scale is pre-folded into the q rows of w/bias in the wrapper.
    acc = jnp.dot(w_ref[...], xn.astype(jnp.bfloat16),
                  preferred_element_type=jnp.float32)      # (3C, Lp)
    qkv_ref[0] = (acc + bias_ref[...]).astype(qkv_ref.dtype)


# ---------------------------------------------------------------------------
# Kernel 2: per-(batch, head, q-tile) flash-style attention over kv tiles + residual
# ---------------------------------------------------------------------------
def _attn_kernel(*refs, has_bias, n_kv, use_bf16_exp):
    if n_kv == 1:
        if has_bias:
            x_ref, q_ref, k_ref, v_ref, bias_ref, o_ref = refs
        else:
            x_ref, q_ref, k_ref, v_ref, o_ref = refs
            bias_ref = None
        m_sc = l_sc = acc_sc = None
    else:
        if has_bias:
            x_ref, q_ref, k_ref, v_ref, bias_ref, o_ref, m_sc, l_sc, acc_sc = refs
        else:
            x_ref, q_ref, k_ref, v_ref, o_ref, m_sc, l_sc, acc_sc = refs
            bias_ref = None

    q = q_ref[0]                                           # (ch, Lq) bf16, scale folded in
    k = k_ref[0]                                           # (ch, tk) bf16
    v = v_ref[0]                                           # (ch, tk) bf16

    # transposed logits: wt[s, t] = sum_c k[c, s] * q[c, t]  -> (tk, Lq), f32 accum
    wt = lax.dot_general(k, q, (((0,), (0,)), ((), ())),
                         preferred_element_type=jnp.float32)
    if bias_ref is not None:
        wt = wt + bias_ref[...]                            # additive -inf mask on padded keys

    def _p_and_sum(diff):
        # diff is f32 (so the -1e30 mask saturates safely before any downcast)
        if use_bf16_exp:
            p16 = jnp.exp(diff.astype(jnp.bfloat16))       # bf16 EUP on v6e/v7x
            return p16, jnp.sum(p16.astype(jnp.float32), axis=0, keepdims=True)
        p = jnp.exp(diff)
        return p.astype(jnp.bfloat16), jnp.sum(p, axis=0, keepdims=True)

    if n_kv == 1:
        # single-shot softmax: no running max / denominator bookkeeping at all
        m = jnp.max(wt, axis=0, keepdims=True)             # (1, Lq)
        p16, l = _p_and_sum(wt - m)
        pv = jnp.dot(v, p16, preferred_element_type=jnp.float32)   # (ch, Lq)
        inv_l = pl.reciprocal(l, approx=True)              # EUP slot
        o_ref[0] = (x_ref[0].astype(jnp.float32) + pv * inv_l).astype(o_ref.dtype)
        return

    kv = pl.program_id(3)
    m_tile = jnp.max(wt, axis=0, keepdims=True)            # (1, Lq)

    @pl.when(kv == 0)
    def _():
        # first tile writes the state directly (no zero-init + rescale of zeros)
        p16, l = _p_and_sum(wt - m_tile)
        m_sc[...] = m_tile
        l_sc[...] = l
        acc_sc[...] = jnp.dot(v, p16, preferred_element_type=jnp.float32)

    @pl.when(kv > 0)
    def _():
        m_prev = m_sc[...]
        m_new = jnp.maximum(m_prev, m_tile)
        alpha = jnp.exp(m_prev - m_new)                    # (1, Lq) f32
        p16, l = _p_and_sum(wt - m_new)
        l_sc[...] = alpha * l_sc[...] + l
        acc_sc[...] = alpha * acc_sc[...] + jnp.dot(v, p16,
                                                    preferred_element_type=jnp.float32)
        m_sc[...] = m_new

    @pl.when(kv == pl.num_programs(3) - 1)
    def _():
        inv_l = pl.reciprocal(l_sc[...], approx=True)
        out = x_ref[0].astype(jnp.float32) + acc_sc[...] * inv_l
        o_ref[0] = out.astype(o_ref.dtype)


# ---------------------------------------------------------------------------
# Wrapper
# ---------------------------------------------------------------------------
def rouss_attention_block(x, gamma, beta, conv_w, conv_b, *, num_heads=1,
                          max_kv_tile=None):
    orig_shape = x.shape
    B, C = int(x.shape[0]), int(x.shape[1])
    L = 1
    for s in x.shape[2:]:
        L *= int(s)

    num_groups = 32
    assert C % num_groups == 0, "GroupNorm(32, C) requires C % 32 == 0"
    assert C % num_heads == 0
    ch = C // num_heads
    assert ch % 8 == 0, "head dim must be a multiple of 8 for TPU sublane tiling"

    in_dtype = x.dtype
    xb = x.dtype.itemsize
    cap = _vmem_cap_bytes()
    use_bf16_exp = _use_bf16_exp()

    # lane-dense layout: pad flattened spatial dim to a multiple of 128
    L_pad = max(128, _round_up(L, 128))
    x3 = x.reshape(B, C, L)
    if L_pad != L:
        x3 = jnp.pad(x3, ((0, 0), (0, 0), (0, L_pad - L)))

    # query tile (bounds the (tk, Lq) logits and (ch, Lq) accumulator)
    Lq = next(t for t in (512, 256, 128) if L_pad % t == 0)
    n_q = L_pad // Lq

    # kv tile sized against the VMEM cap (bigger tiles on v5e/v6e, v7x-safe otherwise)
    tk_cands = [t for t in (1024, 512, 256, 128) if t <= L_pad and L_pad % t == 0]
    if max_kv_tile is not None:
        tk_cands = [t for t in tk_cands if t <= max_kv_tile] or [128]
    tk = tk_cands[-1]
    est2 = None
    for cand in tk_cands:
        est = _attn_vmem_estimate(ch, Lq, cand, xb)
        if est <= 0.6 * cap:
            tk, est2 = cand, est
            break
    if est2 is None:
        est2 = _attn_vmem_estimate(ch, Lq, tk, xb)
    n_kv = L_pad // tk

    # ----- parameters: fold softmax scale (1/sqrt(ch)) into the q-rows of the conv ----
    scale_sq = 1.0 / math.sqrt(float(ch))
    w_full = conv_w.reshape(3 * C, C).astype(jnp.float32)
    w_full = w_full.at[:C].multiply(scale_sq)
    w_bf = w_full.astype(jnp.bfloat16)
    b_full = conv_b.reshape(3 * C).astype(jnp.float32)
    b_full = b_full.at[:C].multiply(scale_sq)
    bias2 = b_full.reshape(3 * C, 1)

    gamma2 = gamma.reshape(C, 1).astype(jnp.float32)
    beta2 = beta.reshape(C, 1).astype(jnp.float32)

    # block-diagonal group-averaging matrix: 1/(gsz*L) where channels share a group
    gsz = C // num_groups
    grp = jnp.arange(C, dtype=jnp.int32) // gsz
    gmask = (grp[:, None] == grp[None, :]).astype(jnp.float32) / float(gsz * L)

    # ---------------- kernel 1: GN + merged 1x1 conv -> qkv (bf16), grid=(B,) ----------
    est1 = (2 * C * L_pad * xb + 2 * 3 * C * C * 2 + 2 * C * C * 4
            + 2 * 3 * C * L_pad * 2
            + 3 * C * L_pad * 4 + C * L_pad * 2 + 3 * C * L_pad * 4)
    qkv = pl.pallas_call(
        functools.partial(_gn_qkv_kernel, eps=1e-5, l_true=L, l_pad=L_pad),
        out_shape=jax.ShapeDtypeStruct((B, 3 * C, L_pad), jnp.bfloat16),
        grid_spec=pltpu.PrefetchScalarGridSpec(
            num_scalar_prefetch=0,
            grid=(B,),
            in_specs=[
                pl.BlockSpec((1, C, L_pad), lambda b: (b, 0, 0)),   # x
                pl.BlockSpec((C, 1), lambda b: (0, 0)),             # gn gamma
                pl.BlockSpec((C, 1), lambda b: (0, 0)),             # gn beta
                pl.BlockSpec((3 * C, C), lambda b: (0, 0)),         # conv weight (q rows pre-scaled)
                pl.BlockSpec((3 * C, 1), lambda b: (0, 0)),         # conv bias
                pl.BlockSpec((C, C), lambda b: (0, 0)),             # group-avg matrix
            ],
            out_specs=pl.BlockSpec((1, 3 * C, L_pad), lambda b: (b, 0, 0)),
        ),
        compiler_params=pltpu.CompilerParams(
            dimension_semantics=("parallel",),
            vmem_limit_bytes=_vmem_limit(est1, cap),
        ),
    )(x3, gamma2, beta2, w_bf, bias2, gmask)

    # ------------- kernel 2: flash attention over kv tiles + residual ------------------
    has_bias = L_pad != L

    in_specs = [
        pl.BlockSpec((1, ch, Lq), lambda b, h, qi, kv: (b, h, qi)),            # x residual
        pl.BlockSpec((1, ch, Lq), lambda b, h, qi, kv: (b, h, qi)),            # q tile
        pl.BlockSpec((1, ch, tk), lambda b, h, qi, kv: (b, num_heads + h, kv)),        # k tile
        pl.BlockSpec((1, ch, tk), lambda b, h, qi, kv: (b, 2 * num_heads + h, kv)),    # v tile
    ]
    args = [x3, qkv, qkv, qkv]
    if has_bias:
        key_bias = jnp.where(jnp.arange(L_pad) < L, 0.0, _NEG_INF)
        key_bias = key_bias.astype(jnp.float32).reshape(L_pad, 1)
        in_specs.append(pl.BlockSpec((tk, 1), lambda b, h, qi, kv: (kv, 0)))   # key mask bias
        args.append(key_bias)

    scratch = []
    if n_kv > 1:
        scratch = [
            pltpu.VMEM((1, Lq), jnp.float32),    # running max
            pltpu.VMEM((1, Lq), jnp.float32),    # running denominator
            pltpu.VMEM((ch, Lq), jnp.float32),   # running numerator
        ]

    out = pl.pallas_call(
        functools.partial(_attn_kernel, has_bias=has_bias, n_kv=n_kv,
                          use_bf16_exp=use_bf16_exp),
        out_shape=jax.ShapeDtypeStruct((B, C, L_pad), in_dtype),
        grid_spec=pltpu.PrefetchScalarGridSpec(
            num_scalar_prefetch=0,
            grid=(B, num_heads, n_q, n_kv),
            in_specs=in_specs,
            out_specs=pl.BlockSpec((1, ch, Lq), lambda b, h, qi, kv: (b, h, qi)),
            scratch_shapes=scratch,
        ),
        compiler_params=pltpu.CompilerParams(
            dimension_semantics=("parallel", "parallel", "parallel", "arbitrary"),
            vmem_limit_bytes=_vmem_limit(est2, cap),
        ),
    )(*args)

    if L_pad != L:
        out = out[:, :, :L]
    return out.reshape(orig_shape)


# ---------------------------------------------------------------------------
# Pure-JAX reference (mirrors the PyTorch forward) for a correctness check
# ---------------------------------------------------------------------------
def _reference(x, gamma, beta, conv_w, conv_b, *, num_heads):
    B, C = x.shape[0], x.shape[1]
    L = 1
    for s in x.shape[2:]:
        L *= int(s)
    x3 = x.reshape(B, C, L).astype(jnp.float32)

    G = 32
    xg = x3.reshape(B, G, (C // G) * L)
    mean = xg.mean(axis=2, keepdims=True)
    var = ((xg - mean) ** 2).mean(axis=2, keepdims=True)
    xn = ((xg - mean) / jnp.sqrt(var + 1e-5)).reshape(B, C, L)
    xn = xn * gamma[None, :, None] + beta[None, :, None]

    qkv = jnp.einsum('oc,bcl->bol', conv_w, xn) + conv_b[None, :, None]
    q, k, v = jnp.split(qkv, 3, axis=1)

    ch = C // num_heads
    qh = q.reshape(B * num_heads, ch, L)
    kh = k.reshape(B * num_heads, ch, L)
    vh = v.reshape(B * num_heads, ch, L)
    scale = 1.0 / math.sqrt(math.sqrt(ch))
    wgt = jnp.einsum('bct,bcs->bts', qh * scale, kh * scale)
    wgt = jax.nn.softmax(wgt, axis=-1)
    a = jnp.einsum('bts,bcs->bct', wgt, vh)
    h = a.reshape(B, C, L)
    return (x3 + h).reshape(x.shape)


if __name__ == "__main__":
    def _check(x, gamma, beta, conv_w, conv_b, num_heads, **kw):
        out = rouss_attention_block(x, gamma, beta, conv_w, conv_b,
                                    num_heads=num_heads, **kw)
        out = jax.block_until_ready(out)
        ref = _reference(x, gamma, beta, conv_w, conv_b, num_heads=num_heads)
        assert out.shape == x.shape
        err = float(jnp.max(jnp.abs(out - ref)))
        # bf16 MXU operands (f32 accumulation) -> relaxed tolerance vs the f32 reference
        assert jnp.allclose(out, ref, atol=2e-2, rtol=2e-2), f"max err {err}"

    # GroupNorm(32, C) requires C % 32 == 0 -> smallest interesting: C = 64
    B, C, H, W = 2, 64, 8, 8

    key = jax.random.PRNGKey(0)
    kx, kg, kb, kw_, kc, kx2 = jax.random.split(key, 6)

    x = jax.random.normal(kx, (B, C, H, W), dtype=jnp.float32)
    gamma = 1.0 + 0.1 * jax.random.normal(kg, (C,), dtype=jnp.float32)
    beta = 0.1 * jax.random.normal(kb, (C,), dtype=jnp.float32)
    conv_w = 0.05 * jax.random.normal(kw_, (3 * C, C), dtype=jnp.float32)
    conv_b = 0.05 * jax.random.normal(kc, (3 * C,), dtype=jnp.float32)

    # 1) padded L (64 -> 128), single kv tile -> single-shot softmax path + key mask
    _check(x, gamma, beta, conv_w, conv_b, num_heads=2)

    # 2) unpadded L = 256 with tk forced to 128 -> exercises the online-softmax path
    x2 = jax.random.normal(kx2, (1, C, 16, 16), dtype=jnp.float32)
    _check(x2, gamma, beta, conv_w, conv_b, num_heads=1, max_kv_tile=128)

    print("KERNEL_OK")
</pallas_src>

<mosaic_0001>
module attributes {stable_mosaic.version = 11 : i64} {
  func.func @_gn_qkv_kernel(%arg0: i32, %arg1: memref<1x64x128xf32, #tpu.memory_space<vmem>>, %arg2: memref<64x1xf32, #tpu.memory_space<vmem>>, %arg3: memref<64x1xf32, #tpu.memory_space<vmem>>, %arg4: memref<192x64xbf16, #tpu.memory_space<vmem>>, %arg5: memref<192x1xf32, #tpu.memory_space<vmem>>, %arg6: memref<64x64xf32, #tpu.memory_space<vmem>>, %arg7: memref<1x192x128xbf16, #tpu.memory_space<vmem>>) attributes {dimension_semantics = [#tpu.dimension_semantics<parallel>], iteration_bounds = array<i64: 2>, scalar_prefetch = 0 : i64, scratch_operands = 0 : i64, tpu.core_type = #tpu.core_type<tc>, window_params = [{transform_indices = @transform_0, window_bounds = array<i64: 1, 64, 128>}, {pipeline_mode = #tpu.pipeline_mode<synchronous>, transform_indices = @transform_1, window_bounds = array<i64: 64, 1>}, {pipeline_mode = #tpu.pipeline_mode<synchronous>, transform_indices = @transform_2, window_bounds = array<i64: 64, 1>}, {pipeline_mode = #tpu.pipeline_mode<synchronous>, transform_indices = @transform_3, window_bounds = array<i64: 192, 64>}, {pipeline_mode = #tpu.pipeline_mode<synchronous>, transform_indices = @transform_4, window_bounds = array<i64: 192, 1>}, {pipeline_mode = #tpu.pipeline_mode<synchronous>, transform_indices = @transform_5, window_bounds = array<i64: 64, 64>}, {transform_indices = @transform_6, window_bounds = array<i64: 1, 192, 128>}]} {
    %c0 = arith.constant 0 : index
    %c0_0 = arith.constant 0 : index
    %c0_1 = arith.constant 0 : index
    %0 = vector.load %arg1[%c0, %c0_0, %c0_1] : memref<1x64x128xf32, #tpu.memory_space<vmem>>, vector<1x64x128xf32>
    %1 = vector.shape_cast %0 : vector<1x64x128xf32> to vector<64x128xf32>
    %c0_2 = arith.constant 0 : index
    %c0_3 = arith.constant 0 : index
    %2 = vector.load %arg6[%c0_2, %c0_3] : memref<64x64xf32, #tpu.memory_space<vmem>>, vector<64x64xf32>
    %cst = arith.constant dense<0.000000e+00> : vector<64xf32>
    %3 = vector.multi_reduction <add>, %1, %cst [1] : vector<64x128xf32> to vector<64xf32>
    %4 = vector.shape_cast %3 : vector<64xf32> to vector<64x1xf32>
    %cst_4 = arith.constant dense<0.000000e+00> : vector<64x1xf32>
    %5 = tpu.matmul %2, %4, %cst_4 {dimension_numbers = #tpu.dot_dimension_numbers<[1], [0], [0], [1], [0, 0, 1, 1], [], []>} : vector<64x64xf32>, vector<64x1xf32>, vector<64x1xf32> -> vector<64x1xf32>
    %6 = vector.broadcast %5 : vector<64x1xf32> to vector<64x128xf32>
    %7 = arith.subf %1, %6 : vector<64x128xf32>
    %8 = arith.mulf %7, %7 : vector<64x128xf32>
    %cst_5 = arith.constant dense<0.000000e+00> : vector<64xf32>
    %9 = vector.multi_reduction <add>, %8, %cst_5 [1] : vector<64x128xf32> to vector<64xf32>
    %10 = vector.shape_cast %9 : vector<64xf32> to vector<64x1xf32>
    %11 = arith.mulf %5, %5 : vector<64x1xf32>
    %cst_6 = arith.constant 6.400000e+01 : f32
    %12 = vector.broadcast %cst_6 : f32 to vector<64x1xf32>
    %13 = arith.mulf %12, %11 : vector<64x1xf32>
    %14 = arith.subf %10, %13 : vector<64x1xf32>
    %cst_7 = arith.constant dense<0.000000e+00> : vector<64x1xf32>
    %15 = tpu.matmul %2, %14, %cst_7 {dimension_numbers = #tpu.dot_dimension_numbers<[1], [0], [0], [1], [0, 0, 1, 1], [], []>} : vector<64x64xf32>, vector<64x1xf32>, vector<64x1xf32> -> vector<64x1xf32>
    %cst_8 = arith.constant 9.99999974E-6 : f32
    %16 = vector.broadcast %cst_8 : f32 to vector<64x1xf32>
    %17 = arith.addf %15, %16 : vector<64x1xf32>
    %18 = math.rsqrt %17 : vector<64x1xf32>
    %c0_9 = arith.constant 0 : index
    %c0_10 = arith.constant 0 : index
    %19 = vector.load %arg2[%c0_9, %c0_10] : memref<64x1xf32, #tpu.memory_space<vmem>>, vector<64x1xf32>
    %20 = arith.mulf %18, %19 : vector<64x1xf32>
    %21 = vector.broadcast %20 : vector<64x1xf32> to vector<64x128xf32>
    %22 = arith.mulf %7, %21 : vector<64x128xf32>
    %c0_11 = arith.constant 0 : index
    %c0_12 = arith.constant 0 : index
    %23 = vector.load %arg3[%c0_11, %c0_12] : memref<64x1xf32, #tpu.memory_space<vmem>>, vector<64x1xf32>
    %24 = vector.broadcast %23 : vector<64x1xf32> to vector<64x128xf32>
    %25 = arith.addf %22, %24 : vector<64x128xf32>
    %c0_13 = arith.constant 0 : index
    %c0_14 = arith.constant 0 : index
    %26 = vector.load %arg4[%c0_13, %c0_14] : memref<192x64xbf16, #tpu.memory_space<vmem>>, vector<192x64xbf16>
    %27 = arith.truncf %25 : vector<64x128xf32> to vector<64x128xbf16>
    %cst_15 = arith.constant dense<0.000000e+00> : vector<192x128xf32>
    %28 = tpu.matmul %26, %27, %cst_15 {dimension_numbers = #tpu.dot_dimension_numbers<[1], [0], [0], [1], [0, 0, 1, 1], [], []>} : vector<192x64xbf16>, vector<64x128xbf16>, vector<192x128xf32> -> vector<192x128xf32>
    %c0_16 = arith.constant 0 : index
    %c0_17 = arith.constant 0 : index
    %29 = vector.load %arg5[%c0_16, %c0_17] : memref<192x1xf32, #tpu.memory_space<vmem>>, vector<192x1xf32>
    %30 = vector.broadcast %29 : vector<192x1xf32> to vector<192x128xf32>
    %31 = arith.addf %28, %30 : vector<192x128xf32>
    %32 = arith.truncf %31 : vector<192x128xf32> to vector<192x128xbf16>
    %c0_18 = arith.constant 0 : index
    %c0_19 = arith.constant 0 : index
    %c0_20 = arith.constant 0 : index
    %33 = vector.load %arg7[%c0_18, %c0_19, %c0_20] : memref<1x192x128xbf16, #tpu.memory_space<vmem>>, vector<1x192x128xbf16>
    %34 = vector.shape_cast %33 : vector<1x192x128xbf16> to vector<192x128xbf16>
    %35 = vector.shape_cast %32 : vector<192x128xbf16> to vector<1x192x128xbf16>
    tpu.vector_store %arg7[%c0_18, %c0_19, %c0_20], %35 {strides = array<i32>} : memref<1x192x128xbf16, #tpu.memory_space<vmem>>, vector<1x192x128xbf16>,
    return
  }
  func.func @transform_0(%arg0: i32) -> (i32, i32, i32) {
    %c0_i32 = arith.constant 0 : i32
    %c0_i32_0 = arith.constant 0 : i32
    %c0_i32_1 = arith.constant 0 : i32
    return %arg0, %c0_i32, %c0_i32_0 : i32, i32, i32
  }
  func.func @transform_1(%arg0: i32) -> (i32, i32) {
    %c0_i32 = arith.constant 0 : i32
    %c0_i32_0 = arith.constant 0 : i32
    %c0_i32_1 = arith.constant 0 : i32
    return %c0_i32, %c0_i32_0 : i32, i32
  }
  func.func @transform_2(%arg0: i32) -> (i32, i32) {
    %c0_i32 = arith.constant 0 : i32
    %c0_i32_0 = arith.constant 0 : i32
    %c0_i32_1 = arith.constant 0 : i32
    return %c0_i32, %c0_i32_0 : i32, i32
  }
  func.func @transform_3(%arg0: i32) -> (i32, i32) {
    %c0_i32 = arith.constant 0 : i32
    %c0_i32_0 = arith.constant 0 : i32
    %c0_i32_1 = arith.constant 0 : i32
    return %c0_i32, %c0_i32_0 : i32, i32
  }
  func.func @transform_4(%arg0: i32) -> (i32, i32) {
    %c0_i32 = arith.constant 0 : i32
    %c0_i32_0 = arith.constant 0 : i32
    %c0_i32_1 = arith.constant 0 : i32
    return %c0_i32, %c0_i32_0 : i32, i32
  }
  func.func @transform_5(%arg0: i32) -> (i32, i32) {
    %c0_i32 = arith.constant 0 : i32
    %c0_i32_0 = arith.constant 0 : i32
    %c0_i32_1 = arith.constant 0 : i32
    return %c0_i32, %c0_i32_0 : i32, i32
  }
  func.func @transform_6(%arg0: i32) -> (i32, i32, i32) {
    %c0_i32 = arith.constant 0 : i32
    %c0_i32_0 = arith.constant 0 : i32
    %c0_i32_1 = arith.constant 0 : i32
    return %arg0, %c0_i32, %c0_i32_0 : i32, i32, i32
  }
}

</mosaic_0001>

<bundles_post_ra>
// kernel: tpu_custom_call.1
= control target key start
LH: loop header
LB: loop body
LE: loop exit
PB: predicated region body
PF: predicated region fallthrough
CT: control target
= control target key end

     0   :  { %11 = vsyncpa [#allocation3], 0  ;;  %s1965_s0 = inlined_call_operand.vmem [shape: f32[2,64,128], index: 0, kind: input, shape index: {}]   ;;  %s1966_s1 = inlined_call_operand.vmem [shape: f32[64,1], index: 1, kind: input, shape index: {}]   ;;  %s1967_s2 = inlined_call_operand.vmem [shape: f32[64,1], index: 2, kind: input, shape index: {}]   ;;  %s1968_s3 = inlined_call_operand.vmem [shape: bf16[192,64], index: 3, kind: input, shape index: {}]   ;;  %s1969_s4 = inlined_call_operand.vmem [shape: f32[192,1], index: 4, kind: input, shape index: {}]   ;;  %s1970_s5 = inlined_call_operand.vmem [shape: f32[64,64], index: 5, kind: input, shape index: {}]   ;;  %s1971_s6 = inlined_call_operand.hbm [shape: bf16[2,192,128], index: 6, kind: output, shape index: {}]  }
   0x1   :  { %13 = vsyncpa [#allocation3 + $0x1], 0  ;;  %s1499_s21 = smov 0   ;;  %s1501_s22 = smov 0  }
   0x2   :  { %s1503_s23 = smov 0   ;;  %s1505_s24 = smov 0  }
   0x3 LB: > { %s1520_s25 = sadd.s32 4294967295, %s1459_s24   ;;  %s1149_s26 = sadd.s32 4294967294, %s1459_s24   ;;  %s1459_s24 = sphi %s1505_s24, %s1977_s24   ;;  %s1455_s23 = sphi %s1503_s23, %s1976_s23   ;;  %s1451_s22 = sphi %s1501_s22, %s1975_s22   ;;  %s1447_s21 = sphi %s1499_s21, %s1974_s21  }
   0x4   : > { %s1524_s27 = sadd.s32 1, %s1459_s24   ;;  %s157_s28 = sadd.s32 1, %s1455_s23 }
   0x5   : > { %s154_s29 = ssub.s32 %s1459_s24, %s1524_s27  ;;  %p167_p0 = scmp.ne.s32.totalorder %s1455_s23, %s1451_s22 }
   0x6   : > { %p155_p1 = scmp.eq.s32.totalorder %s154_s29, 0  ;;  %p168_p2 = scmp.eq.s32.totalorder %s1520_s25, 1 }
   0x7   : > { %p173_p3 = scmp.ne.s32.totalorder %s1451_s22, %s1447_s21  ;;  %p174_p4 = scmp.eq.s32.totalorder %s1149_s26, 1 }
   0x8   : > { %s1535_s30 = scalar_select %p155_p1, %s1455_s23, %s157_s28  }
   0x9   : > { %p1537_p5 = por %p168_p2, %p167_p0  ;;  %p1541_p6 = por %p174_p4, %p173_p3 }
   0xa   : > { %p1152_p7 = scmp.ge.s32.totalorder %s1459_s24, 1  ;;  %p215_p8 = scmp.lt.s32.totalorder %s1459_s24, 3 }
   0xc   : > { %p216_p9 = pnand %p1152_p7, %p215_p8 }
   0xd   : > { %p245_p10 = scmp.lt.s32.totalorder (!%p216_p9), %s1520_s25, 1  ;;  %s242_s14 = sand.u32 (!%p216_p9), 1, %s1451_s22  }
   0xe   : > { %219 = sbr.rel (%p216_p9) target bundleno = 1129 (0x469), region = 44  ;;  %s1417_s12 = scalar_lea.hbm (!%p216_p9), %s1971_s6, 192 }
   0xf   : > { %s1334_s15 = smul.u32 (!%p216_p9), 96, %s242_s14 }
  0x10   : > { %s1335_s17 = smul.u32 (!%p216_p9), 96, %s1520_s25 }
  0x11   : > { %s1915_s16 = scalar_lea.vmem (!%p216_p9), [#allocation2], %s1334_s15 }
  0x12   : > { %s1083_s20 = scalar_lea.hbm (!%p216_p9), %s1971_s6, %s1335_s17  ;;  %s1084_s26 = sshll.u32 (!%p216_p9), %s1915_s16, 4  ;;  %s1085_s26 = int_to_ptr.vmem [resolvable:$true] %s1084_s26 }
  0x13   : > { %s246_s9 = scalar_select %p245_p10, %s1520_s25, 1  ;;  %v1579_v16 = vld [vmem:[%s1970_s5] sm:$0xff]  ;;  %vm283_vm0 = vcmask 523264   ;;  %v1584_v17 = vld [vmem:[%s1970_s5 + $0x30] sm:$0xff]  ;;  %v1593_v18 = vld [vmem:[%s1970_s5 + $0x8] sm:$0xff]  ;;  %v1461_v20 = vmov 0  }
  0x14   : > { %v1598_v19 = vld [vmem:[%s1970_s5 + $0x38] sm:$0xff]  ;;  %1378 = vset.pattern.permute.xlu0 %v1461_v20  ;;  %1379 = vset.pattern.permute.xlu2 %v1461_v20  ;;  %v1607_v21 = vld [vmem:[%s1970_s5 + $0x10] sm:$0xff]  ;;  %v1621_v23 = vld [vmem:[%s1970_s5 + $0x20] sm:$0xff]  ;;  %s1086_s28 = sshll.u32 %s1083_s20, 4  ;;  %s1072_s25 = scalar_lea.sflag [#allocation3], %s242_s14  ;;  %s1087_s28 = int_to_ptr.hbm [resolvable:$true] %s1086_s28 }
  0x15   : > { %s1234_s10 = sshll.u32 %s246_s9, 6  ;;  %1380 = vset.pattern.permute.xlu1 %v1461_v20  ;;  %v1614_v22 = vld [vmem:[%s1970_s5 + $0x18] sm:$0xff]  ;;  %v1628_v24 = vld [vmem:[%s1970_s5 + $0x28] sm:$0xff]  ;;  %v636_v58 = vld [vmem:[%s1967_s2 + $0x30] sm:$0xff]  ;;  %s1411_s29 = sshra.s32 %s1087_s28, 4  ;;  %s1412_s29 = int_to_ptr.hbm [resolvable:$true] %s1411_s29 }
  0x16   : > { %s249_s13 = scalar_lea.vmem %s1965_s0, %s1234_s10  ;;  %v637_v57 = vld [vmem:[%s1967_s2 + $0x38] sm:$0xff]  ;;  %v634_v59 = vld [vmem:[%s1967_s2 + $0x20] sm:$0xff]  ;;  %v635_v60 = vld [vmem:[%s1967_s2 + $0x28] sm:$0xff]  ;;  %s1413_s9 = scalar_lea.hbm %s1412_s29, 96 }
  0x17   : > { %v1552_v0 = vld [vmem:[%s249_s13 + $0x38] sm:$0xff]  ;;  %v1554_v1 = vld [vmem:[%s249_s13 + $0x28] sm:$0xff]  ;;  %v1561_v3 = vld [vmem:[%s249_s13 + $0x30] sm:$0xff]  ;;  %p1414_p11 = scmp.ne.s32.totalorder %s1412_s29, %s1413_s9  ;;  %p1418_p0 = scmp.lt.s32.totalorder %s1412_s29, %s1971_s6 }
  0x18   : > { %281 = vadd.xlane.f32.xlu0 %v1552_v0  ;;  %277 = vadd.xlane.f32.xlu1 %v1554_v1  ;;  %v1558_v2 = vld [vmem:[%s249_s13 + $0x18] sm:$0xff]  ;;  %v1563_v4 = vld [vmem:[%s249_s13 + $0x20] sm:$0xff]  ;;  %v1565_v5 = vld [vmem:[%s249_s13 + $0x10] sm:$0xff]  ;;  %p1419_p1 = scmp.lt.s32.totalorder %s1417_s12, %s1413_s9 }
  0x19   : > { %273 = vadd.xlane.f32.xlu2 %v1558_v2  ;;  %v1570_v6 = vld [vmem:[%s249_s13 + $0x8] sm:$0xff]  ;;  %v1572_v7 = vld [vmem:[%s249_s13] sm:$0xff]  ;;  %v632_v61 = vld [vmem:[%s1967_s2 + $0x10] sm:$0xff]  ;;  %p1415_p12 = pnand %p1414_p11, %p1537_p5 }
  0x1a   : > { %p1420_p2 = por %p1419_p1, %p1418_p0 }
  0x1b   : > { %p1416_p13 = pneg %p1415_p12 }
  0x1d   : > { %p1421_p3 = pnand %p1420_p2, %p1416_p13 }
  0x20   : > { %279 = vadd.xlane.f32.xlu0 %v1561_v3  ;;  %275 = vadd.xlane.f32.xlu1 %v1563_v4 }
  0x21   : > { %271 = vadd.xlane.f32.xlu2 %v1565_v5 }
  0x28   : > { %269 = vadd.xlane.f32.xlu0 %v1570_v6  ;;  %267 = vadd.xlane.f32.xlu1 %v1572_v7 }
  0x8b   : > { %v282_v8 = vpop.xlane.xlu0 %281  ;;  %v278_v9 = vpop.xlane.xlu1 %277 }
  0x8c   : > { %316 = vmatpush.msra.mxu0 %v282_v8  ;;  %1318 = vmatpush.msra.mxu1 %v282_v8  ;;  %v274_v10 = vpop.xlane.xlu2 %273 }
  0x93   : > { %v280_v11 = vpop.xlane.xlu0 %279  ;;  %v276_v12 = vpop.xlane.xlu1 %275 }
  0x94   : > { %317 = vmatpush.msra.mxu0 %v280_v11  ;;  %1319 = vmatpush.msra.mxu1 %v280_v11  ;;  %v272_v13 = vpop.xlane.xlu2 %271 }
  0x96   : > { %318 = vmatpush.msra.mxu0 %v278_v9  ;;  %1320 = vmatpush.msra.mxu1 %v278_v9 }
  0x98   : > { %319 = vmatpush.msra.mxu0 %v276_v12  ;;  %1321 = vmatpush.msra.mxu1 %v276_v12 }
  0x9a   : > { %320 = vmatpush.msra.mxu0 %v274_v10  ;;  %1322 = vmatpush.msra.mxu1 %v274_v10 }
  0x9b   : > { %v270_v14 = vpop.xlane.xlu0 %269  ;;  %v268_v15 = vpop.xlane.xlu1 %267 }
  0x9c   : > { %321 = vmatpush.msra.mxu0 %v272_v13  ;;  %1323 = vmatpush.msra.mxu1 %v272_v13 }
  0x9e   : > { %322 = vmatpush.msra.mxu0 %v270_v14  ;;  %1324 = vmatpush.msra.mxu1 %v270_v14 }
  0xa0   : > { %323 = vmatpush.msra.mxu0 %v268_v15  ;;  %1325 = vmatpush.msra.mxu1 %v268_v15 }
  0xa1   : > { %1155 = vmatmul.msk.f32.vlgmr.msra.gmra.mxu0 %vm283_vm0, %v1579_v16  ;;  %1161 = vmatmul.msk.f32.vlgmr.msra.gmra.mxu1 %vm283_vm0, %v1584_v17 }
  0xa9   : > { %1156 = vmatmul.msk.f32.gmra.mxu0 %vm283_vm0, %v1593_v18  ;;  %1162 = vmatmul.msk.f32.gmra.mxu1 %vm283_vm0, %v1598_v19 }
  0xb1   : > { %1157 = vmatmul.msk.f32.gmra.mxu0 %vm283_vm0, %v1607_v21 }
  0xb9   : > { %1158 = vmatmul.msk.f32.gmra.mxu0 %vm283_vm0, %v1614_v22 }
  0xc1   : > { %1159 = vmatmul.msk.f32.gmra.mxu0 %vm283_vm0, %v1621_v23 }
  0xc9   : > { %1160 = vmatmul.msk.f32.gmra.mxu0 %vm283_vm0, %v1628_v24 }
 0x11e   : > { %v1632_v25 = vpop.f32.mrf.mxu0  ;;  %v343_v26 = vpop.f32.mrf.mxu1 }
 0x11f   : > { %381 = vperm.xlu0 %1378, %v343_v26  }
 0x126   : > { %v1634_v27 = vpop.f32.mrf.mxu0  ;;  %v346_v28 = vpop.f32.mrf.mxu1 }
 0x127   : > { %386 = vperm.xlu2 %1379, %v346_v28   ;;  %v428_v62 = vmul.f32 %v346_v28, %v346_v28  ;;  %v422_v28 = vmul.f32 %v1634_v27, %v1634_v27 }
 0x129   : > { %v436_v63 = vmul.f32 64.0, %v428_v62 }
 0x12e   : > { %v1636_v29 = vpop.f32.mrf.mxu0 }
 0x12f   : > { %v423_v15 = vmul.f32 %v1636_v29, %v1636_v29 }
 0x136   : > { %v1638_v30 = vpop.f32.mrf.mxu0 }
 0x137   : > { %366 = vperm.xlu2 %1379, %v1638_v30   ;;  %v424_v9 = vmul.f32 %v1638_v30, %v1638_v30 }
 0x139   : > { %v432_v20 = vmul.f32 64.0, %v424_v9 }
 0x13e   : > { %v337_v31 = vpop.f32.mrf.mxu0 }
 0x13f   : > { %371 = vperm.xlu2 %1379, %v337_v31  }
 0x146   : > { %v340_v32 = vpop.f32.mrf.mxu0 }
 0x147   : > { %356 = vperm.xlu2 %1379, %v1634_v27   ;;  %376 = vperm.xlu1 %1380, %v340_v32  }
 0x14f   : > { %361 = vperm.xlu1 %1380, %v1636_v29  }
 0x157   : > { %351 = vperm.xlu1 %1380, %v1632_v25  }
 0x181   : > { %v387_v33 = vpop.permute.xlu2 %386 }
 0x182   : > { %v1645_v34 = vsub.f32 %v1552_v0, %v387_v33 }
 0x184   : > { %v404_v35 = vmul.f32 %v1645_v34, %v1645_v34 }
 0x186   : > { %419 = vadd.xlane.f32.xlu0 %v404_v35  ;;  %v430_v35 = vmul.f32 64.0, %v422_v28 }
 0x191   : > { %v382_v36 = vpop.permute.xlu0 %381  ;;  %v367_v37 = vpop.permute.xlu2 %366 }
 0x192   : > { %v1650_v38 = vsub.f32 %v1561_v3, %v382_v36  ;;  %v1653_v39 = vsub.f32 %v1558_v2, %v367_v37  ;;  %v427_v2 = vmul.f32 %v343_v26, %v343_v26  ;;  %v421_v37 = vmul.f32 %v1632_v25, %v1632_v25 }
 0x194   : > { %v400_v40 = vmul.f32 %v1653_v39, %v1653_v39  ;;  %v403_v41 = vmul.f32 %v1650_v38, %v1650_v38  ;;  %v435_v3 = vmul.f32 64.0, %v427_v2  ;;  %v429_v29 = vmul.f32 64.0, %v421_v37 }
 0x196   : > { %411 = vadd.xlane.f32.xlu0 %v400_v40  ;;  %417 = vadd.xlane.f32.xlu2 %v403_v41 }
 0x199   : > { %v372_v42 = vpop.permute.xlu2 %371 }
 0x19a   : > { %v1660_v43 = vsub.f32 %v1563_v4, %v372_v42 }
 0x19c   : > { %v401_v44 = vmul.f32 %v1660_v43, %v1660_v43 }
 0x19e   : > { %413 = vadd.xlane.f32.xlu2 %v401_v44 }
 0x1a1   : > { %v357_v45 = vpop.permute.xlu2 %356 }
 0x1a2   : > { %v1665_v46 = vsub.f32 %v1570_v6, %v357_v45  ;;  %v426_v6 = vmul.f32 %v340_v32, %v340_v32 }
 0x1a4   : > { %v398_v47 = vmul.f32 %v1665_v46, %v1665_v46  ;;  %v434_v10 = vmul.f32 64.0, %v426_v6  ;;  %v569_v6 = vld [vmem:[%s1966_s1 + $0x18] sm:$0xff] }
 0x1a6   : > { %407 = vadd.xlane.f32.xlu2 %v398_v47 }
 0x1b9   : > { %v377_v48 = vpop.permute.xlu1 %376 }
 0x1ba   : > { %v1670_v49 = vsub.f32 %v1554_v1, %v377_v48 }
 0x1bc   : > { %v402_v50 = vmul.f32 %v1670_v49, %v1670_v49 }
 0x1be   : > { %415 = vadd.xlane.f32.xlu1 %v402_v50 }
 0x1c1   : > { %v362_v51 = vpop.permute.xlu1 %361 }
 0x1c2   : > { %v1675_v52 = vsub.f32 %v1565_v5, %v362_v51 }
 0x1c4   : > { %v399_v53 = vmul.f32 %v1675_v52, %v1675_v52 }
 0x1c6   : > { %409 = vadd.xlane.f32.xlu1 %v399_v53 }
 0x1c9   : > { %v352_v54 = vpop.permute.xlu1 %351 }
 0x1ca   : > { %v1680_v55 = vsub.f32 %v1572_v7, %v352_v54  ;;  %v425_v7 = vmul.f32 %v337_v31, %v337_v31  ;;  %v431_v31 = vmul.f32 64.0, %v423_v15  ;;  %v568_v54 = vld [vmem:[%s1966_s1 + $0x10] sm:$0xff] }
 0x1cc   : > { %v397_v56 = vmul.f32 %v1680_v55, %v1680_v55  ;;  %v433_v12 = vmul.f32 64.0, %v425_v7 }
 0x1ce   : > { %405 = vadd.xlane.f32.xlu0 %v397_v56 }
 0x1df   : > { %675 = vperm.xlu1 %1380, %v637_v57  }
 0x1e2   : > { %670 = vperm.xlu0 %1378, %v636_v58  }
 0x1e7   : > { %660 = vperm.xlu1 %1380, %v634_v59  }
 0x1ea   : > { %665 = vperm.xlu0 %1378, %v635_v60  }
 0x1f2   : > { %650 = vperm.xlu0 %1378, %v632_v61  }
 0x1f9   : > { %v420_v0 = vpop.xlane.xlu0 %419 }
 0x1fa   : > { %v444_v1 = vsub.f32 %v420_v0, %v436_v63 }
 0x1fc   : > { %453 = vmatpush.msrb.mxu1 %v444_v1 }
 0x209   : > { %v418_v4 = vpop.xlane.xlu2 %417  ;;  %v412_v14 = vpop.xlane.xlu0 %411 }
 0x20a   : > { %v443_v5 = vsub.f32 %v418_v4, %v435_v3  ;;  %v440_v32 = vsub.f32 %v412_v14, %v432_v20 }
 0x20c   : > { %454 = vmatpush.msrb.mxu1 %v443_v5 }
 0x211   : > { %v414_v8 = vpop.xlane.xlu2 %413 }
 0x212   : > { %v441_v26 = vsub.f32 %v414_v8, %v433_v12 }
 0x219   : > { %v408_v33 = vpop.xlane.xlu2 %407 }
 0x21a   : > { %v438_v40 = vsub.f32 %v408_v33, %v430_v35 }
 0x231   : > { %v416_v11 = vpop.xlane.xlu1 %415 }
 0x232   : > { %v442_v13 = vsub.f32 %v416_v11, %v434_v10 }
 0x234   : > { %455 = vmatpush.msrb.mxu1 %v442_v13 }
 0x236   : > { %456 = vmatpush.msrb.mxu1 %v441_v26 }
 0x238   : > { %457 = vmatpush.msrb.mxu1 %v440_v32  ;;  %v570_v32 = vld [vmem:[%s1966_s1 + $0x20] sm:$0xff] }
 0x239   : > { %v410_v30 = vpop.xlane.xlu1 %409 }
 0x23a   : > { %v439_v36 = vsub.f32 %v410_v30, %v431_v31 }
 0x23c   : > { %458 = vmatpush.msrb.mxu1 %v439_v36 }
 0x23e   : > { %459 = vmatpush.msrb.mxu1 %v438_v40 }
 0x241   : > { %v406_v41 = vpop.xlane.xlu0 %405 }
 0x242   : > { %v437_v42 = vsub.f32 %v406_v41, %v429_v29 }
 0x244   : > { %460 = vmatpush.msrb.mxu1 %v437_v42 }
 0x245   : > { %1163 = vmatmul.msk.f32.vlgmr.msrb.gmra.mxu1 %vm283_vm0, %v1579_v16 }
 0x24d   : > { %1164 = vmatmul.msk.f32.gmra.mxu1 %vm283_vm0, %v1593_v18 }
 0x255   : > { %1165 = vmatmul.msk.f32.gmra.mxu1 %vm283_vm0, %v1607_v21 }
 0x25d   : > { %1166 = vmatmul.msk.f32.gmra.mxu1 %vm283_vm0, %v1614_v22 }
 0x265   : > { %1167 = vmatmul.msk.f32.gmra.mxu1 %vm283_vm0, %v1621_v23 }
 0x26d   : > { %1168 = vmatmul.msk.f32.gmra.mxu1 %vm283_vm0, %v1628_v24 }
 0x275   : > { %1169 = vmatmul.msk.f32.gmra.mxu1 %vm283_vm0, %v1584_v17 }
 0x27d   : > { %1170 = vmatmul.msk.f32.gmra.mxu1 %vm283_vm0, %v1598_v19 }
 0x2c2   : > { %v462_v16 = vpop.f32.mrf.mxu1 }
 0x2c3   : > { %v1733_v1 = vadd.f32 1e-05, %v462_v16 }
 0x2ca   : > { %v465_v18 = vpop.f32.mrf.mxu1 }
 0x2cb   : > { %v1723_v22 = vadd.f32 1e-05, %v465_v18 }
 0x2cd   : > { %vm502_vm11 = vweird.f32 %v1723_v22 }
 0x2d2   : > { %v468_v25 = vpop.f32.mrf.mxu1 }
 0x2d3   : > { %v469_v27 = vadd.f32 1e-05, %v468_v25 }
 0x2d5   : > { %1381 = vrsqrt.f32 %v469_v27  ;;  %vm512_vm2 = vweird.f32 %v469_v27 }
 0x2da   : > { %v471_v21 = vpop.f32.mrf.mxu1 }
 0x2db   : > { %v1382_v44 = vpop.eup %1381  ;;  %v472_v45 = vadd.f32 1e-05, %v471_v21 }
 0x2dc   : > { %v507_v23 = vmul.f32 %v1382_v44, %v469_v27  ;;  %vm513_vm1 = vweird.f32 %v1382_v44  ;;  %v571_v27 = vld [vmem:[%s1966_s1 + $0x28] sm:$0xff] }
 0x2dd   : > { %1383 = vrsqrt.f32 %v472_v45  ;;  %vm514_vm3 = vmor %vm512_vm2, %vm513_vm1  ;;  %vm522_vm5 = vweird.f32 %v472_v45 }
 0x2de   : > { %v508_v47 = vmul.f32 %v1382_v44, %v507_v23  ;;  %1385 = vrsqrt.f32 %v1723_v22 }
 0x2e0   : > { %v509_v24 = vmul.f32 0.5, %v508_v47 }
 0x2e2   : > { %v510_v17 = vsub.f32 1.5, %v509_v24  ;;  %v474_v48 = vpop.f32.mrf.mxu1 }
 0x2e3   : > { %v1384_v19 = vpop.eup %1383  ;;  %v475_v50 = vadd.f32 1e-05, %v474_v48 }
 0x2e4   : > { %v517_v51 = vmul.f32 %v1384_v19, %v472_v45  ;;  %v511_v53 = vmul.f32 %v1382_v44, %v510_v17  ;;  %v1729_v56 = vpop.eup %1385  ;;  %vm523_vm4 = vweird.f32 %v1384_v19 }
 0x2e5   : > { %1387 = vrsqrt.f32 %v475_v50  ;;  %v497_v60 = vmul.f32 %v1729_v56, %v1723_v22  ;;  %vm524_vm6 = vmor %vm522_vm5, %vm523_vm4  ;;  %vm532_vm8 = vweird.f32 %v475_v50  ;;  %vm503_vm10 = vweird.f32 %v1729_v56 }
 0x2e6   : > { %v518_v57 = vmul.f32 %v1384_v19, %v517_v51  ;;  %v515_v58 = vsel %vm514_vm3, %v1382_v44, %v511_v53  ;;  %vm504_vm13 = vmor %vm502_vm11, %vm503_vm10  ;;  %v567_v44 = vld [vmem:[%s1966_s1 + $0x8] sm:$0xff] }
 0x2e7   : > { %v576_v59 = vmul.f32 %v568_v54, %v515_v58  ;;  %v498_v3 = vmul.f32 %v1729_v56, %v497_v60  ;;  %v572_v54 = vld [vmem:[%s1966_s1 + $0x30] sm:$0xff] }
 0x2e8   : > { %v519_v61 = vmul.f32 0.5, %v518_v57 }
 0x2e9   : > { %594 = vperm.xlu2 %1379, %v576_v59   ;;  %v499_v10 = vmul.f32 0.5, %v498_v3  ;;  %v714_v59 = vld [vmem:[%s1969_s4] sm:$0xff] }
 0x2ea   : > { %v520_v62 = vsub.f32 1.5, %v519_v61  ;;  %v477_v63 = vpop.f32.mrf.mxu1 }
 0x2eb   : > { %v1388_v0 = vpop.eup %1387  ;;  %v478_v2 = vadd.f32 1e-05, %v477_v63  ;;  %v500_v20 = vsub.f32 1.5, %v499_v10  ;;  %v631_v10 = vld [vmem:[%s1967_s2 + $0x8] sm:$0xff] }
 0x2ec   : > { %v527_v4 = vmul.f32 %v1388_v0, %v475_v50  ;;  %v521_v5 = vmul.f32 %v1384_v19, %v520_v62  ;;  %vm533_vm7 = vweird.f32 %v1388_v0 }
 0x2ed   : > { %1389 = vrsqrt.f32 %v478_v2  ;;  %vm534_vm9 = vmor %vm532_vm8, %vm533_vm7  ;;  %v501_v37 = vmul.f32 %v1729_v56, %v500_v20  ;;  %vm542_vm14 = vweird.f32 %v478_v2  ;;  %vm492_vm7 = vweird.f32 %v1733_v1  ;;  %v719_v20 = vld [vmem:[%s1969_s4 + $0x28] sm:$0xff] }
 0x2ee   : > { %v528_v7 = vmul.f32 %v1388_v0, %v527_v4  ;;  %v525_v8 = vsel %vm524_vm6, %v1384_v19, %v521_v5  ;;  %1391 = vrsqrt.f32 %v1733_v1  ;;  %v566_v4 = vld [vmem:[%s1966_s1] sm:$0xff] }
 0x2ef   : > { %v577_v9 = vmul.f32 %v569_v6, %v525_v8  ;;  %v505_v21 = vsel %vm504_vm13, %v1729_v56, %v501_v37  ;;  %v717_v6 = vld [vmem:[%s1969_s4 + $0x18] sm:$0xff]  ;;  %v728_v37 = vld [vmem:[%s1969_s4 + $0x70] sm:$0xff] }
 0x2f0   : > { %v529_v11 = vmul.f32 0.5, %v528_v7  ;;  %v575_v24 = vmul.f32 %v567_v44, %v505_v21  ;;  %v633_v8 = vld [vmem:[%s1967_s2 + $0x18] sm:$0xff]  ;;  %v676_v21 = vpop.permute.xlu1 %675 }
 0x2f1   : > { %599 = vperm.xlu1 %1380, %v577_v9   ;;  %v720_v9 = vld [vmem:[%s1969_s4 + $0x30] sm:$0xff] }
 0x2f2   : > { %v530_v12 = vsub.f32 1.5, %v529_v11  ;;  %v480_v13 = vpop.f32.mrf.mxu1  ;;  %v630_v11 = vld [vmem:[%s1967_s2] sm:$0xff] }
 0x2f3   : > { %v1390_v14 = vpop.eup %1389  ;;  %v481_v15 = vadd.f32 1e-05, %v480_v13  ;;  %v716_v13 = vld [vmem:[%s1969_s4 + $0x10] sm:$0xff] }
 0x2f4   : > { %v537_v26 = vmul.f32 %v1390_v14, %v478_v2  ;;  %v531_v28 = vmul.f32 %v1388_v0, %v530_v12  ;;  %v1743_v31 = vpop.eup %1391  ;;  %vm543_vm12 = vweird.f32 %v1390_v14  ;;  %v573_v2 = vld [vmem:[%s1966_s1 + $0x38] sm:$0xff]  ;;  %v723_v12 = vld [vmem:[%s1969_s4 + $0x48] sm:$0xff] }
 0x2f5   : > { %1393 = vrsqrt.f32 %v481_v15  ;;  %v487_v40 = vmul.f32 %v1743_v31, %v1733_v1  ;;  %vm544_vm15 = vmor %vm542_vm14, %vm543_vm12  ;;  %vm552_vm2 = vweird.f32 %v481_v15  ;;  %vm493_vm6 = vweird.f32 %v1743_v31 }
 0x2f6   : > { %v538_v33 = vmul.f32 %v1390_v14, %v537_v26  ;;  %v535_v30 = vsel %vm534_vm9, %v1388_v0, %v531_v28  ;;  %vm494_vm9 = vmor %vm492_vm7, %vm493_vm6  ;;  %v718_v26 = vld [vmem:[%s1969_s4 + $0x20] sm:$0xff]  ;;  %v729_v28 = vld [vmem:[%s1969_s4 + $0x78] sm:$0xff] }
 0x2f7   : > { %v578_v35 = vmul.f32 %v570_v32, %v535_v30  ;;  %v488_v22 = vmul.f32 %v1743_v31, %v487_v40  ;;  %v722_v32 = vld [vmem:[%s1969_s4 + $0x40] sm:$0xff]  ;;  %v725_v30 = vld [vmem:[%s1969_s4 + $0x58] sm:$0xff]  ;;  %v727_v40 = vld [vmem:[%s1969_s4 + $0x68] sm:$0xff] }
 0x2f8   : > { %v539_v36 = vmul.f32 0.5, %v538_v33  ;;  %v732_v33 = vld [vmem:[%s1969_s4 + $0x90] sm:$0xff] }
 0x2f9   : > { %604 = vperm.xlu0 %1378, %v578_v35   ;;  %v489_v48 = vmul.f32 0.5, %v488_v22  ;;  %v724_v35 = vld [vmem:[%s1969_s4 + $0x50] sm:$0xff] }
 0x2fa   : > { %v540_v29 = vsub.f32 1.5, %v539_v36  ;;  %v483_v41 = vpop.f32.mrf.mxu1  ;;  %v735_v36 = vld [vmem:[%s1969_s4 + $0xa8] sm:$0xff] }
 0x2fb   : > { %v1394_v42 = vpop.eup %1393  ;;  %v484_v16 = vadd.f32 1e-05, %v483_v41  ;;  %v490_v56 = vsub.f32 1.5, %v489_v48  ;;  %v730_v41 = vld [vmem:[%s1969_s4 + $0x80] sm:$0xff] }
 0x2fc   : > { %v547_v18 = vmul.f32 %v1394_v42, %v481_v15  ;;  %v541_v25 = vmul.f32 %v1390_v14, %v540_v29  ;;  %vm553_vm1 = vweird.f32 %v1394_v42  ;;  %v726_v15 = vld [vmem:[%s1969_s4 + $0x60] sm:$0xff]  ;;  %v731_v29 = vld [vmem:[%s1969_s4 + $0x88] sm:$0xff] }
 0x2fd   : > { %1395 = vrsqrt.f32 %v484_v16  ;;  %vm554_vm3 = vmor %vm552_vm2, %vm553_vm1  ;;  %vm562_vm4 = vweird.f32 %v484_v16  ;;  %v491_v62 = vmul.f32 %v1743_v31, %v490_v56 }
 0x2fe   : > { %v548_v45 = vmul.f32 %v1394_v42, %v547_v18  ;;  %v545_v23 = vsel %vm544_vm15, %v1390_v14, %v541_v25  ;;  %v715_v14 = vld [vmem:[%s1969_s4 + $0x8] sm:$0xff]  ;;  %v737_v18 = vld [vmem:[%s1969_s4 + $0xb8] sm:$0xff]  ;;  %v671_v25 = vpop.permute.xlu0 %670 }
 0x2ff   : > { %v579_v47 = vmul.f32 %v571_v27, %v545_v23  ;;  %v495_v3 = vsel %vm494_vm9, %v1743_v31, %v491_v62  ;;  %v721_v31 = vld [vmem:[%s1969_s4 + $0x38] sm:$0xff]  ;;  %v736_v27 = vld [vmem:[%s1969_s4 + $0xb0] sm:$0xff] }
 0x300   : > { %v549_v17 = vmul.f32 0.5, %v548_v45  ;;  %v574_v1 = vmul.f32 %v566_v4, %v495_v3  ;;  %v661_v45 = vpop.permute.xlu1 %660 }
 0x301   : > { %609 = vperm.xlu2 %1379, %v579_v47   ;;  %589 = vperm.xlu0 %1378, %v575_v24  }
 0x302   : > { %v550_v19 = vsub.f32 1.5, %v549_v17 }
 0x303   : > { %v1396_v50 = vpop.eup %1395 }
 0x304   : > { %v557_v51 = vmul.f32 %v1396_v50, %v484_v16  ;;  %v551_v53 = vmul.f32 %v1394_v42, %v550_v19  ;;  %vm563_vm5 = vweird.f32 %v1396_v50  ;;  %v733_v16 = vld [vmem:[%s1969_s4 + $0x98] sm:$0xff] }
 0x305   : > { %vm564_vm8 = vmor %vm562_vm4, %vm563_vm5 }
 0x306   : > { %v558_v57 = vmul.f32 %v1396_v50, %v557_v51  ;;  %v555_v58 = vsel %vm554_vm3, %v1394_v42, %v551_v53  ;;  %v734_v42 = vld [vmem:[%s1969_s4 + $0xa0] sm:$0xff]  ;;  %v666_v44 = vpop.permute.xlu0 %665 }
 0x307   : > { %v580_v60 = vmul.f32 %v572_v54, %v555_v58 }
 0x308   : > { %v559_v61 = vmul.f32 0.5, %v558_v57 }
 0x309   : > { %614 = vperm.xlu1 %1380, %v580_v60   ;;  %740 = vperm.xlu0 %1378, %v714_v59  }
 0x30a   : > { %v560_v63 = vsub.f32 1.5, %v559_v61 }
 0x30c   : > { %v561_v0 = vmul.f32 %v1396_v50, %v560_v63 }
 0x30e   : > { %v565_v5 = vsel %vm564_vm8, %v1396_v50, %v561_v0  ;;  %v651_v47 = vpop.permute.xlu0 %650 }
 0x30f   : > { %v581_v7 = vmul.f32 %v573_v2, %v565_v5 }
 0x311   : > { %619 = vperm.xlu2 %1379, %v581_v7   ;;  %755 = vperm.xlu0 %1378, %v717_v6  }
 0x312   : > { %584 = vperm.xlu1 %1380, %v574_v1   ;;  %v1235_v1 = vld [vmem:[%s1968_s3] sm:$0xff] }
 0x319   : > { %655 = vperm.xlu2 %1379, %v633_v8   ;;  %770 = vperm.xlu0 %1378, %v720_v9   ;;  %v1237_v8 = vld [vmem:[%s1968_s3 + $0x10] sm:$0xff]  ;;  %v1238_v9 = vld [vmem:[%s1968_s3 + $0x18] sm:$0xff] }
 0x31a   : > { %645 = vperm.xlu1 %1380, %v631_v10   ;;  %v1243_v10 = vld [vmem:[%s1968_s3 + $0x40] sm:$0xff] }
 0x321   : > { %640 = vperm.xlu2 %1379, %v630_v11   ;;  %785 = vperm.xlu0 %1378, %v723_v12   ;;  %v1239_v11 = vld [vmem:[%s1968_s3 + $0x20] sm:$0xff]  ;;  %v1244_v12 = vld [vmem:[%s1968_s3 + $0x48] sm:$0xff] }
 0x322   : > { %750 = vperm.xlu1 %1380, %v716_v13   ;;  %v1240_v13 = vld [vmem:[%s1968_s3 + $0x28] sm:$0xff] }
 0x329   : > { %745 = vperm.xlu2 %1379, %v715_v14   ;;  %800 = vperm.xlu0 %1378, %v726_v15   ;;  %v1245_v14 = vld [vmem:[%s1968_s3 + $0x50] sm:$0xff] }
 0x32a   : > { %765 = vperm.xlu1 %1380, %v719_v20   ;;  %v1241_v15 = vld [vmem:[%s1968_s3 + $0x30] sm:$0xff]  ;;  %v1246_v20 = vld [vmem:[%s1968_s3 + $0x58] sm:$0xff] }
 0x331   : > { %760 = vperm.xlu2 %1379, %v718_v26   ;;  %815 = vperm.xlu0 %1378, %v729_v28  }
 0x332   : > { %780 = vperm.xlu1 %1380, %v722_v32  }
 0x339   : > { %775 = vperm.xlu2 %1379, %v721_v31   ;;  %830 = vperm.xlu0 %1378, %v732_v33  }
 0x33a   : > { %795 = vperm.xlu1 %1380, %v725_v30  }
 0x341   : > { %790 = vperm.xlu2 %1379, %v724_v35   ;;  %845 = vperm.xlu0 %1378, %v735_v36  }
 0x342   : > { %810 = vperm.xlu1 %1380, %v728_v37  }
 0x343   : > { %v595_v22 = vpop.permute.xlu2 %594 }
 0x344   : > { %v624_v61 = vmul.f32 %v595_v22, %v1675_v52 }
 0x346   : > { %v680_v2 = vadd.f32 %v651_v47, %v624_v61 }
 0x349   : > { %805 = vperm.xlu2 %1379, %v727_v40  }
 0x34a   : > { %825 = vperm.xlu1 %1380, %v731_v29  }
 0x351   : > { %820 = vperm.xlu2 %1379, %v730_v41  }
 0x352   : > { %840 = vperm.xlu1 %1380, %v734_v42  }
 0x359   : > { %835 = vperm.xlu2 %1379, %v733_v16  }
 0x35a   : > { %855 = vperm.xlu1 %1380, %v737_v18  }
 0x35b   : > { %v610_v23 = vpop.permute.xlu2 %609 }
 0x35c   : > { %v627_v54 = vmul.f32 %v610_v23, %v1670_v49 }
 0x35e   : > { %v683_v62 = vadd.f32 %v666_v44, %v627_v54 }
 0x361   : > { %850 = vperm.xlu2 %1379, %v736_v27  }
 0x363   : > { %v600_v24 = vpop.permute.xlu1 %599 }
 0x364   : > { %v625_v63 = vmul.f32 %v600_v24, %v1653_v39 }
 0x36b   : > { %v620_v17 = vpop.permute.xlu2 %619  ;;  %v605_v48 = vpop.permute.xlu0 %604 }
 0x36c   : > { %v629_v19 = vmul.f32 %v620_v17, %v1645_v34  ;;  %v626_v51 = vmul.f32 %v605_v48, %v1660_v43 }
 0x36e   : > { %v685_v56 = vadd.f32 %v676_v21, %v629_v19  ;;  %v682_v58 = vadd.f32 %v661_v45, %v626_v51 }
 0x370   : > { %v712_v43 = vpack.c.bf16 %v683_v62, %v682_v58 }
 0x373   : > { %v656_v60 = vpop.permute.xlu2 %655  ;;  %v590_v49 = vpop.permute.xlu0 %589 }
 0x374   : > { %v681_v34 = vadd.f32 %v656_v60, %v625_v63  ;;  %v623_v52 = vmul.f32 %v590_v49, %v1665_v46  ;;  %v1242_v46 = vld [vmem:[%s1968_s3 + $0x38] sm:$0xff] }
 0x37b   : > { %v615_v50 = vpop.permute.xlu1 %614  ;;  %v641_v39 = vpop.permute.xlu2 %640 }
 0x37c   : > { %v628_v53 = vmul.f32 %v615_v50, %v1650_v38  ;;  %v711_v38 = vpack.c.bf16 %v681_v34, %v680_v2  ;;  %v741_v26 = vpop.permute.xlu0 %740 }
 0x37e   : > { %v684_v57 = vadd.f32 %v671_v25, %v628_v53 }
 0x380   : > { %v713_v59 = vpack.c.bf16 %v685_v56, %v684_v57 }
 0x382   : > { %958 = vmatpush.bf16.msrb.mxu0 %v713_v59  ;;  %1326 = vmatpush.bf16.msra.mxu2 %v713_v59 }
 0x383   : > { %1327 = vmatpush.bf16.msra.mxu3 %v713_v59  ;;  %v746_v31 = vpop.permute.xlu2 %745 }
 0x384   : > { %v585_v0 = vpop.permute.xlu1 %584  ;;  %v756_v28 = vpop.permute.xlu0 %755 }
 0x385   : > { %v622_v3 = vmul.f32 %v585_v0, %v1680_v55  ;;  %v1236_v55 = vld [vmem:[%s1968_s3 + $0x8] sm:$0xff] }
 0x386   : > { %959 = vmatpush.bf16.msrb.mxu0 %v712_v43  ;;  %1328 = vmatpush.bf16.msra.mxu2 %v712_v43 }
 0x387   : > { %1329 = vmatpush.bf16.msra.mxu3 %v712_v43  ;;  %v678_v5 = vadd.f32 %v641_v39, %v622_v3 }
 0x38a   : > { %960 = vmatpush.bf16.msrb.mxu0 %v711_v38  ;;  %1330 = vmatpush.bf16.msra.mxu2 %v711_v38 }
 0x38b   : > { %1331 = vmatpush.bf16.msra.mxu3 %v711_v38  ;;  %v761_v35 = vpop.permute.xlu2 %760 }
 0x38c   : > { %v646_v4 = vpop.permute.xlu1 %645  ;;  %v771_v33 = vpop.permute.xlu0 %770 }
 0x38d   : > { %v679_v6 = vadd.f32 %v646_v4, %v623_v52 }
 0x38f   : > { %v710_v7 = vpack.c.bf16 %v679_v6, %v678_v5 }
 0x391   : > { %961 = vmatpush.bf16.msrb.mxu0 %v710_v7  ;;  %1332 = vmatpush.bf16.msra.mxu2 %v710_v7 }
 0x392   : > { %1333 = vmatpush.bf16.msra.mxu3 %v710_v7 }
 0x393   : > { %v776_v40 = vpop.permute.xlu2 %775 }
 0x394   : > { %1219 = vmatmul.msk.bf16.vlgmr.msrb.gmra.mxu0 %vm283_vm0, %v1235_v1  ;;  %1221 = vmatmul.msk.bf16.vlgmr.msra.gmra.mxu2 %vm283_vm0, %v1237_v8  ;;  %v751_v32 = vpop.permute.xlu1 %750  ;;  %v786_v36 = vpop.permute.xlu0 %785 }
 0x395   : > { %1226 = vmatmul.msk.bf16.vlgmr.msra.gmra.mxu3 %vm283_vm0, %v1242_v46 }
 0x39b   : > { %v791_v44 = vpop.permute.xlu2 %790 }
 0x39c   : > { %v766_v30 = vpop.permute.xlu1 %765  ;;  %v1909_v41 = vpop.permute.xlu0 %800 }
 0x3a3   : > { %v806_v56 = vpop.permute.xlu2 %805 }
 0x3a4   : > { %1220 = vmatmul.msk.bf16.gmra.mxu0 %vm283_vm0, %v1236_v55  ;;  %1222 = vmatmul.msk.bf16.gmra.mxu2 %vm283_vm0, %v1238_v9  ;;  %v781_v37 = vpop.permute.xlu1 %780  ;;  %v816_v45 = vpop.permute.xlu0 %815 }
 0x3a5   : > { %1227 = vmatmul.msk.bf16.gmra.mxu3 %vm283_vm0, %v1243_v10 }
 0x3ab   : > { %v821_v63 = vpop.permute.xlu2 %820 }
 0x3ac   : > { %v1911_v42 = vpop.permute.xlu1 %795  ;;  %v831_v6 = vpop.permute.xlu0 %830 }
 0x3b3   : > { %v836_v1 = vpop.permute.xlu2 %835 }
 0x3b4   : > { %1223 = vmatmul.msk.bf16.gmra.mxu2 %vm283_vm0, %v1239_v11  ;;  %v811_v47 = vpop.permute.xlu1 %810 }
 0x3b5   : > { %1228 = vmatmul.msk.bf16.gmra.mxu3 %vm283_vm0, %v1244_v12 }
 0x3bc   : > { %v826_v0 = vpop.permute.xlu1 %825 }
 0x3c4   : > { %1224 = vmatmul.msk.bf16.gmra.mxu2 %vm283_vm0, %v1240_v13 }
 0x3c5   : > { %1229 = vmatmul.msk.bf16.gmra.mxu3 %vm283_vm0, %v1245_v14 }
 0x3d4   : > { %1225 = vmatmul.msk.bf16.gmra.mxu2 %vm283_vm0, %v1241_v15  ;;  %v846_v15 = vpop.permute.xlu0 %845 }
 0x3d5   : > { %1230 = vmatmul.msk.bf16.gmra.mxu3 %vm283_vm0, %v1246_v20 }
 0x411   : > { %v963_v29 = vpop.f32.mrf.mxu0 }
 0x412   : > { %v964_v27 = vadd.f32 %v963_v29, %v741_v26  ;;  %v841_v26 = vpop.permute.xlu1 %840  ;;  %v851_v29 = vpop.permute.xlu2 %850 }
 0x417   : > { %v973_v16 = vpop.f32.mrf.mxu2 }
 0x418   : > { %v998_v18 = vpop.f32.mrf.mxu3  ;;  %v974_v24 = vadd.f32 %v973_v16, %v761_v35 }
 0x419   : > { %v965_v25 = vpop.f32.mrf.mxu0  ;;  %v999_v19 = vadd.f32 %v998_v18, %v811_v47 }
 0x41a   : > { %v966_v21 = vadd.f32 %v965_v25, %v746_v31 }
 0x41c   : > { %v1250_v22 = vpack.c.bf16 %v966_v21, %v964_v27 }
 0x41e   : > { %1251 = vst [vmem:[%s1915_s16] sm:$0xff] %v1250_v22  }
 0x41f   : > { %v975_v23 = vpop.f32.mrf.mxu2 }
 0x420   : > { %v976_v17 = vadd.f32 %v975_v23, %v766_v30  ;;  %v1000_v48 = vpop.f32.mrf.mxu3 }
 0x421   : > { %v1001_v50 = vadd.f32 %v1000_v48, %v816_v45  ;;  %v968_v51 = vpop.f32.mrf.mxu0 }
 0x422   : > { %v1260_v53 = vpack.c.bf16 %v976_v17, %v974_v24  ;;  %v969_v60 = vadd.f32 %v968_v51, %v751_v32 }
 0x423   : > { %v1285_v54 = vpack.c.bf16 %v1001_v50, %v999_v19 }
 0x424   : > { %1308 = vst [vmem:[%s1915_s16 + $0x10] sm:$0xff] %v1260_v53  }
 0x425   : > { %1313 = vst [vmem:[%s1915_s16 + $0x38] sm:$0xff] %v1285_v54  }
 0x427   : > { %v978_v57 = vpop.f32.mrf.mxu2 }
 0x428   : > { %v1003_v58 = vpop.f32.mrf.mxu3  ;;  %v979_v43 = vadd.f32 %v978_v57, %v771_v33 }
 0x429   : > { %v970_v59 = vpop.f32.mrf.mxu0  ;;  %v1004_v49 = vadd.f32 %v1003_v58, %v821_v63 }
 0x42a   : > { %v971_v61 = vadd.f32 %v970_v59, %v756_v28 }
 0x42c   : > { %v1255_v62 = vpack.c.bf16 %v971_v61, %v969_v60 }
 0x42e   : > { %1307 = vst [vmem:[%s1915_s16 + $0x8] sm:$0xff] %v1255_v62  }
 0x42f   : > { %v980_v34 = vpop.f32.mrf.mxu2 }
 0x430   : > { %v981_v2 = vadd.f32 %v980_v34, %v776_v40  ;;  %v1005_v38 = vpop.f32.mrf.mxu3 }
 0x431   : > { %v1006_v3 = vadd.f32 %v1005_v38, %v826_v0 }
 0x432   : > { %v1265_v52 = vpack.c.bf16 %v981_v2, %v979_v43 }
 0x433   : > { %v1290_v39 = vpack.c.bf16 %v1006_v3, %v1004_v49 }
 0x434   : > { %1309 = vst [vmem:[%s1915_s16 + $0x18] sm:$0xff] %v1265_v52  }
 0x435   : > { %1314 = vst [vmem:[%s1915_s16 + $0x40] sm:$0xff] %v1290_v39  }
 0x437   : > { %v983_v4 = vpop.f32.mrf.mxu2 }
 0x438   : > { %v1008_v5 = vpop.f32.mrf.mxu3  ;;  %v984_v8 = vadd.f32 %v983_v4, %v781_v37 }
 0x439   : > { %v1009_v9 = vadd.f32 %v1008_v5, %v831_v6 }
 0x43f   : > { %v985_v7 = vpop.f32.mrf.mxu2 }
 0x440   : > { %v986_v46 = vadd.f32 %v985_v7, %v786_v36  ;;  %v1010_v55 = vpop.f32.mrf.mxu3 }
 0x441   : > { %v1011_v10 = vadd.f32 %v1010_v55, %v836_v1 }
 0x442   : > { %v1270_v11 = vpack.c.bf16 %v986_v46, %v984_v8 }
 0x443   : > { %v1295_v12 = vpack.c.bf16 %v1011_v10, %v1009_v9 }
 0x444   : > { %1310 = vst [vmem:[%s1915_s16 + $0x20] sm:$0xff] %v1270_v11  }
 0x445   : > { %1315 = vst [vmem:[%s1915_s16 + $0x48] sm:$0xff] %v1295_v12  }
 0x447   : > { %v988_v13 = vpop.f32.mrf.mxu2 }
 0x448   : > { %v1013_v14 = vpop.f32.mrf.mxu3  ;;  %v989_v28 = vadd.f32 %v988_v13, %v791_v44 }
 0x449   : > { %v1014_v33 = vadd.f32 %v1013_v14, %v841_v26 }
 0x44f   : > { %v990_v20 = vpop.f32.mrf.mxu2 }
 0x450   : > { %v991_v32 = vadd.f32 %v990_v20, %v1911_v42  ;;  %v1015_v31 = vpop.f32.mrf.mxu3  ;;  %v856_v42 = vpop.permute.xlu1 %855 }
 0x451   : > { %v1016_v30 = vadd.f32 %v1015_v31, %v846_v15 }
 0x452   : > { %v1275_v35 = vpack.c.bf16 %v991_v32, %v989_v28 }
 0x453   : > { %v1300_v36 = vpack.c.bf16 %v1016_v30, %v1014_v33 }
 0x454   : > { %1311 = vst [vmem:[%s1915_s16 + $0x28] sm:$0xff] %v1275_v35  }
 0x455   : > { %1316 = vst [vmem:[%s1915_s16 + $0x50] sm:$0xff] %v1300_v36  }
 0x457   : > { %v993_v37 = vpop.f32.mrf.mxu2 }
 0x458   : > { %v1018_v40 = vpop.f32.mrf.mxu3  ;;  %v994_v18 = vadd.f32 %v993_v37, %v1909_v41 }
 0x459   : > { %v1019_v21 = vadd.f32 %v1018_v40, %v851_v29 }
 0x45f   : > { %v995_v16 = vpop.f32.mrf.mxu2 }
 0x460   : > { %v996_v25 = vadd.f32 %v995_v16, %v806_v56  ;;  %v1020_v27 = vpop.f32.mrf.mxu3 }
 0x461   : > { %v1021_v44 = vadd.f32 %v1020_v27, %v856_v42 }
 0x462   : > { %v1280_v22 = vpack.c.bf16 %v996_v25, %v994_v18 }
 0x463   : > { %v1305_v45 = vpack.c.bf16 %v1021_v44, %v1019_v21 }
 0x464   : > { %1312 = vst [vmem:[%s1915_s16 + $0x30] sm:$0xff] %v1280_v22  }
 0x465   : > { %1317 = vst [vmem:[%s1915_s16 + $0x58] sm:$0xff] %v1305_v45  }
 0x466   : > { %1424 = shalt.err (!%p1421_p3)
}
 0x467   : > { %s1462_s14 = smov 64   ;;  %s1463_s16 = smov 4  }
 0x468   : > { %1336 = dma.vmem_to_hbm [thread:$0]  (%p1537_p5), %s1085_s26, 1536, %s1087_s28, %s1072_s25, %s1462_s14, %s1462_s14, %s1463_s16  }
 0x469 PF: > { %p1342_p4 = scmp.ge.s32.totalorder %s1459_s24, 2  ;;  %s1101_s17 = sand.u32 1, %s1447_s21  }
 0x46a   : > { %s1102_s18 = scalar_lea.sflag [#allocation3], %s1101_s17 }
 0x46b   : > { %p1339_p7 = pnand %p1342_p4, %p1541_p6 }
 0x46d   : > { %p1340_p8 = pneg %p1339_p7 }
 0x46f   : > { %1442 = dma.done.wait (%p1340_p8), %s1102_s18, 1536  }
 0x470   : > { %1444 = vsyncadd (%p1340_p8), %s1102_s18, 4294965760  ;;  %p16_p9 = scmp.ge.s32.totalorder %s1524_s27, 4   ;;  %s1974_s21 = smov %s1451_s22 }
 0x471   : > { %s1975_s22 = smov %s1455_s23  ;;  %s1976_s23 = smov %s1535_s30 }
 0x472   : > { %s1977_s24 = smov %s1524_s27  ;;  %18 = sbr.rel (!%p16_p9) target bundleno = 3 (0x3), region = 79 }
 0x477   :  { %1108 = vsyncpa [#allocation3], 1 }
 0x478   :  { %1110 = vsyncpa [#allocation3 + $0x1], 1 }

</bundles_post_ra>
